<compile_context>
chip_gen: v6e
topology: v6e:2x2x1
jax: 0.10.0
libtpu: 0.0.40
codegen_flags: <defaults>
</compile_context>

<pallas_src>
import functools

import jax
import jax.numpy as jnp
from jax.experimental import pallas as pl
from jax.experimental.pallas import tpu as pltpu


LANE = 128
SUBLANE = 8


# ----------------------------------------------------------------------------
# Pallas kernel: fused Recommender forward pass
# ----------------------------------------------------------------------------
def recommender_kernel(
    user_ref, ratings_ref,
    wu1_ref, bu1_ref, wu2_ref, bu2_ref,              # user_data_analyzer (VeryBasicMLP)
    wp1_ref, bp1_ref, wp2_ref, bp2_ref,              # pattern_analyzer
    wf1u_ref, wf1p_ref, bf1_ref, wf2_ref, bf2_ref,   # final_regressor (VeryBasicMLP)
    out_ref,
    p_acc_ref,                                       # (TB, H_p) f32 scratch
    *, wp1_resident, tk,
):
    f32 = jnp.float32
    bf16 = jnp.bfloat16
    k = pl.program_id(1)
    nk = pl.num_programs(1)

    # -- select the (tk, H_p) slab of the big pattern-analyzer weight --------
    if wp1_resident and wp1_ref.shape[0] != tk:
        # wp1 fully resident in VMEM, ratings still k-tiled: slice in-kernel.
        start = pl.multiple_of(k * tk, LANE)
        wp1_tile = wp1_ref[pl.ds(start, tk), :]
    else:
        # either the streamed k-tile or the full resident weight (nk == 1).
        wp1_tile = wp1_ref[...]

    # -- K-tiled contraction: ratings[:, k-tile] @ wp1[k-tile, :] -------------
    partial = jnp.dot(ratings_ref[...].astype(bf16), wp1_tile,
                      preferred_element_type=f32)

    @pl.when(k == 0)
    def _store_first():                 # direct store: no zero-fill + RMW pass
        p_acc_ref[...] = partial

    @pl.when(k != 0)
    def _accumulate():
        p_acc_ref[...] += partial

    # -- everything else runs once per batch tile, at the last K step --------
    @pl.when(k == nk - 1)
    def _finalize():
        # user_data_analyzer: relu(x @ W1 + b1) @ W2 + b2
        x_u = user_ref[...].astype(bf16)
        u_h = jnp.maximum(
            jnp.dot(x_u, wu1_ref[...], preferred_element_type=f32) + bu1_ref[...],
            0.0,
        )
        u_out = (
            jnp.dot(u_h.astype(bf16), wu2_ref[...], preferred_element_type=f32)
            + bu2_ref[...]
        )

        # pattern_analyzer second layer (first layer already accumulated)
        p_h = jnp.maximum(p_acc_ref[...] + bp1_ref[...], 0.0)
        p_out = (
            jnp.dot(p_h.astype(bf16), wp2_ref[...], preferred_element_type=f32)
            + bp2_ref[...]
        )

        # final_regressor on concat([u_out, p_out], -1) without materializing
        # the concat: concat(u, p) @ Wf1 == u @ Wf1[:du] + p @ Wf1[du:]
        f_pre = (
            jnp.dot(u_out.astype(bf16), wf1u_ref[...], preferred_element_type=f32)
            + jnp.dot(p_out.astype(bf16), wf1p_ref[...], preferred_element_type=f32)
            + bf1_ref[...]
        )
        f_h = jnp.maximum(f_pre, 0.0)
        out_ref[...] = (
            jnp.dot(f_h.astype(bf16), wf2_ref[...], preferred_element_type=f32)
            + bf2_ref[...]
        ).astype(out_ref.dtype)


# ----------------------------------------------------------------------------
# Wrapper helpers
# ----------------------------------------------------------------------------
def _round_up(x, m):
    return ((x + m - 1) // m) * m


def _cdiv(a, b):
    return (a + b - 1) // b


def _pad2d(x, rows, cols):
    r, c = x.shape
    if r == rows and c == cols:
        return x
    return jnp.pad(x, ((0, rows - r), (0, cols - c)))


def _make_spec(shape, index_map, buffers=None):
    """BlockSpec with an optional explicit pipeline depth (graceful fallback)."""
    if buffers is None or not hasattr(pl, "Buffered"):
        return pl.BlockSpec(shape, index_map)
    try:
        return pl.BlockSpec(shape, index_map, pipeline_mode=pl.Buffered(buffers))
    except TypeError:
        return pl.BlockSpec(shape, index_map)


def _vmem_budget():
    """(vmem_limit_bytes, working-set budget) sized for the actual chip."""
    try:
        cap = int(pltpu.get_tpu_info().vmem_capacity_bytes)
    except Exception:
        cap = 64 * 1024 * 1024            # conservative: v7x per-TC VMEM
    limit = min(cap * 3 // 4, 100 * 1024 * 1024)   # 48 MiB on v7x, 96 MiB on v5e/v6e
    return limit, limit * 85 // 100


# ----------------------------------------------------------------------------
# Wrapper: padding, tiling, pallas_call
# ----------------------------------------------------------------------------
@functools.partial(jax.jit, static_argnames=("tb_target", "tk_target"))
def recommender_forward(user_data, ratings_matrix, params,
                        *, tb_target=512, tk_target=512):
    (wu1, bu1, wu2, bu2,
     wp1, bp1, wp2, bp2,
     wf1u, wf1p, bf1, wf2, bf2) = params

    B, d_u = user_data.shape
    n_items = ratings_matrix.shape[1]
    h_u, o_u = wu1.shape[1], wu2.shape[1]
    h_p, o_p = wp1.shape[1], wp2.shape[1]
    h_f, o_f = wf2.shape

    # lane-pad every feature dim to a multiple of 128 (zero padding is exact:
    # padded hidden units get zero pre-activation and zero downstream weights).
    d_u_p = _round_up(d_u, LANE)
    h_u_p = _round_up(h_u, LANE)
    o_u_p = _round_up(o_u, LANE)
    h_p_p = _round_up(h_p, LANE)
    o_p_p = _round_up(o_p, LANE)
    h_f_p = _round_up(h_f, LANE)
    o_f_p = _round_up(o_f, LANE)          # lane-dense output; sliced at the end

    # ---- batch tiling: balanced tiles, >=2 tiles when B allows (2-TC / megacore)
    tb_cap = max(SUBLANE, min(tb_target, _round_up(B, SUBLANE)))
    nb = _cdiv(B, tb_cap)
    if B > SUBLANE:
        nb = max(nb, 2)
    tb = _round_up(_cdiv(B, nb), SUBLANE)
    nb = _cdiv(B, tb)
    b_p = nb * tb

    # ---- VMEM budgeting: decide wp1 residency, tk, and ratings pipeline depth
    vmem_limit, budget = _vmem_budget()
    usr_isz = user_data.dtype.itemsize
    rat_isz = ratings_matrix.dtype.itemsize

    n_items_p0 = _round_up(n_items, LANE)
    tk_cap = min(tk_target, n_items_p0)

    fixed_resident = (
        2 * (d_u_p * h_u_p + h_u_p * o_u_p + h_p_p * o_p_p
             + o_u_p * h_f_p + o_p_p * h_f_p + h_f_p * o_f_p)     # bf16 weights
        + 4 * SUBLANE * (h_u_p + o_u_p + h_p_p + o_p_p + h_f_p + o_f_p)  # f32 biases
    )

    def stream_bytes(tk_, rb):
        return (2 * tb * d_u_p * usr_isz           # user (double-buffered)
                + rb * tb * tk_ * rat_isz          # ratings stream
                + 2 * tb * o_f_p * 4               # output (double-buffered)
                + tb * h_p_p * 4)                  # p_acc scratch

    rat_bufs = 3
    if fixed_resident + 2 * n_items_p0 * h_p_p + stream_bytes(n_items_p0, rat_bufs) <= budget:
        wp1_resident, tk = True, n_items_p0                      # nk == 1
    elif (fixed_resident + 2 * _round_up(n_items_p0, tk_cap) * h_p_p
          + stream_bytes(tk_cap, rat_bufs) <= budget):
        wp1_resident, tk = True, tk_cap                          # resident, k-tiled
    else:
        wp1_resident, tk = False, tk_cap                         # streamed, k-tiled
        while tk > LANE and (fixed_resident + 4 * tk * h_p_p
                             + stream_bytes(tk, rat_bufs) > budget):
            tk = max(LANE, (tk // 2) // LANE * LANE)
        if fixed_resident + 4 * tk * h_p_p + stream_bytes(tk, rat_bufs) > budget:
            rat_bufs = 2

    n_items_p = _round_up(n_items_p0, tk)
    nk = n_items_p // tk
    if nb * nk <= 2:
        rat_bufs = min(rat_bufs, 2)

    bf16, f32 = jnp.bfloat16, jnp.float32

    # Activations keep their native dtype (no extra HBM cast pass); weights are
    # bf16 MXU operands, biases f32 (elementwise math stays f32 on the VPU).
    user_p = _pad2d(user_data, b_p, d_u_p)
    ratings_p = _pad2d(ratings_matrix, b_p, n_items_p)

    wu1_p = _pad2d(wu1.astype(bf16), d_u_p, h_u_p)
    bu1_p = _pad2d(bu1.astype(f32), 1, h_u_p)
    wu2_p = _pad2d(wu2.astype(bf16), h_u_p, o_u_p)
    bu2_p = _pad2d(bu2.astype(f32), 1, o_u_p)
    wp1_p = _pad2d(wp1.astype(bf16), n_items_p, h_p_p)
    bp1_p = _pad2d(bp1.astype(f32), 1, h_p_p)
    wp2_p = _pad2d(wp2.astype(bf16), h_p_p, o_p_p)
    bp2_p = _pad2d(bp2.astype(f32), 1, o_p_p)
    wf1u_p = _pad2d(wf1u.astype(bf16), o_u_p, h_f_p)
    wf1p_p = _pad2d(wf1p.astype(bf16), o_p_p, h_f_p)
    bf1_p = _pad2d(bf1.astype(f32), 1, h_f_p)
    wf2_p = _pad2d(wf2.astype(bf16), h_f_p, o_f_p)
    bf2_p = _pad2d(bf2.astype(f32), 1, o_f_p)

    operands = (user_p, ratings_p,
                wu1_p, bu1_p, wu2_p, bu2_p,
                wp1_p, bp1_p, wp2_p, bp2_p,
                wf1u_p, wf1p_p, bf1_p, wf2_p, bf2_p)

    # index maps: activations stream per batch tile, weights stay resident
    act_map = lambda i, k: (i, 0)
    rat_map = lambda i, k: (i, k)
    wp1_map = lambda i, k: (k, 0)
    fix_map = lambda i, k: (0, 0)

    if wp1_resident:
        wp1_spec = _make_spec((n_items_p, h_p_p), fix_map, buffers=1)
    else:
        wp1_spec = _make_spec((tk, h_p_p), wp1_map, buffers=2)

    in_specs = [
        _make_spec((tb, d_u_p), act_map),
        _make_spec((tb, tk), rat_map, buffers=rat_bufs),
        _make_spec((d_u_p, h_u_p), fix_map, buffers=1),
        _make_spec((1, h_u_p), fix_map, buffers=1),
        _make_spec((h_u_p, o_u_p), fix_map, buffers=1),
        _make_spec((1, o_u_p), fix_map, buffers=1),
        wp1_spec,
        _make_spec((1, h_p_p), fix_map, buffers=1),
        _make_spec((h_p_p, o_p_p), fix_map, buffers=1),
        _make_spec((1, o_p_p), fix_map, buffers=1),
        _make_spec((o_u_p, h_f_p), fix_map, buffers=1),
        _make_spec((o_p_p, h_f_p), fix_map, buffers=1),
        _make_spec((1, h_f_p), fix_map, buffers=1),
        _make_spec((h_f_p, o_f_p), fix_map, buffers=1),
        _make_spec((1, o_f_p), fix_map, buffers=1),
    ]
    out_spec = pl.BlockSpec((tb, o_f_p), act_map)

    flops = 2 * b_p * (
        d_u_p * h_u_p + h_u_p * o_u_p
        + n_items_p * h_p_p + h_p_p * o_p_p
        + (o_u_p + o_p_p) * h_f_p + h_f_p * o_f_p
    )
    bytes_accessed = sum(int(op.size) * op.dtype.itemsize for op in operands)
    if not wp1_resident:
        bytes_accessed += (nb - 1) * int(wp1_p.size) * wp1_p.dtype.itemsize
    bytes_accessed += b_p * o_f_p * 4

    kernel = functools.partial(recommender_kernel,
                               wp1_resident=wp1_resident, tk=tk)

    out_padded = pl.pallas_call(
        kernel,
        out_shape=jax.ShapeDtypeStruct((b_p, o_f_p), jnp.float32),
        grid_spec=pltpu.PrefetchScalarGridSpec(
            num_scalar_prefetch=0,
            grid=(nb, nk),
            in_specs=in_specs,
            out_specs=out_spec,
            scratch_shapes=[pltpu.VMEM((tb, h_p_p), jnp.float32)],
        ),
        compiler_params=pltpu.CompilerParams(
            dimension_semantics=("parallel", "arbitrary"),
            vmem_limit_bytes=int(vmem_limit),
        ),
        cost_estimate=pl.CostEstimate(
            flops=int(flops), transcendentals=0,
            bytes_accessed=int(bytes_accessed),
        ),
    )(*operands)

    return out_padded[:B, :o_f]


# ----------------------------------------------------------------------------
# Deterministic parameter initialization (PyTorch nn.Linear-style uniform)
# ----------------------------------------------------------------------------
def _linear_params(key, in_features, out_features):
    kw, kb = jax.random.split(key)
    bound = 1.0 / jnp.sqrt(jnp.float32(in_features))
    w = jax.random.uniform(kw, (in_features, out_features), jnp.float32,
                           minval=-bound, maxval=bound)
    b = jax.random.uniform(kb, (1, out_features), jnp.float32,
                           minval=-bound, maxval=bound)
    return w, b


def init_recommender_params(
    key,
    user_data_input_size, user_factor, user_output_size,
    num_items, pattern_hidden, pattern_output_size,
    final_factor, final_output_len,
):
    keys = jax.random.split(key, 6)
    # user_data_analyzer
    wu1, bu1 = _linear_params(keys[0], user_data_input_size,
                              user_data_input_size * user_factor)
    wu2, bu2 = _linear_params(keys[1], user_data_input_size * user_factor,
                              user_output_size)
    # pattern_analyzer
    wp1, bp1 = _linear_params(keys[2], num_items, pattern_hidden)
    wp2, bp2 = _linear_params(keys[3], pattern_hidden, pattern_output_size)
    # final_regressor (input = user_output_size + pattern_output_size)
    final_in = user_output_size + pattern_output_size
    wf1, bf1 = _linear_params(keys[4], final_in, final_in * final_factor)
    wf2, bf2 = _linear_params(keys[5], final_in * final_factor,
                              final_output_len)
    # Split the first final-regressor weight for the in-kernel concat trick.
    wf1u = wf1[:user_output_size]
    wf1p = wf1[user_output_size:]
    return (wu1, bu1, wu2, bu2,
            wp1, bp1, wp2, bp2,
            wf1u, wf1p, bf1, wf2, bf2)


# ----------------------------------------------------------------------------
# Pure-JAX reference (mirrors the kernel's bf16-operand / f32-accumulate math)
# ----------------------------------------------------------------------------
def reference_forward(user_data, ratings_matrix, params):
    (wu1, bu1, wu2, bu2,
     wp1, bp1, wp2, bp2,
     wf1u, wf1p, bf1, wf2, bf2) = params
    bf16, f32 = jnp.bfloat16, jnp.float32

    def mm(a, w):
        return jnp.dot(a.astype(bf16), w.astype(bf16),
                       preferred_element_type=f32)

    u_h = jnp.maximum(mm(user_data, wu1) + bu1, 0.0)
    u_out = mm(u_h, wu2) + bu2
    p_h = jnp.maximum(mm(ratings_matrix, wp1) + bp1, 0.0)
    p_out = mm(p_h, wp2) + bp2
    f_h = jnp.maximum(mm(u_out, wf1u) + mm(p_out, wf1p) + bf1, 0.0)
    return mm(f_h, wf2) + bf2


# ----------------------------------------------------------------------------
if __name__ == "__main__":
    # Small, forward-consistent demo shapes.
    batch = 8
    user_data_input_size = 16
    user_factor = 4                  # user MLP hidden = 64
    user_output_size = 32
    num_items = 32                   # ratings_matrix: (batch, num_items)
    pattern_hidden = 64
    pattern_output_size = 32
    final_factor = 2                 # final MLP hidden = (32+32)*2 = 128
    final_output_len = 8

    root = jax.random.PRNGKey(0)
    k_params, k_user, k_ratings = jax.random.split(root, 3)

    params = init_recommender_params(
        k_params,
        user_data_input_size, user_factor, user_output_size,
        num_items, pattern_hidden, pattern_output_size,
        final_factor, final_output_len,
    )

    user_data = jax.random.normal(k_user, (batch, user_data_input_size),
                                  jnp.float32)
    ratings_matrix = jax.random.normal(k_ratings, (batch, num_items),
                                       jnp.float32)

    out = recommender_forward(user_data, ratings_matrix, params)
    out = jax.block_until_ready(out)

    ref = reference_forward(user_data, ratings_matrix, params)
    assert out.shape == (batch, final_output_len)
    assert jnp.allclose(out, ref, atol=2e-2, rtol=2e-2), "mismatch vs reference"

    print("KERNEL_OK")
</pallas_src>

<mosaic_0001>
module attributes {stable_mosaic.version = 11 : i64} {
  func.func @recommender_kernel(%arg0: i32, %arg1: i32, %arg2: memref<8x128xf32, #tpu.memory_space<vmem>>, %arg3: memref<8x128xf32, #tpu.memory_space<vmem>>, %arg4: memref<128x128xbf16, #tpu.memory_space<vmem>>, %arg5: memref<1x128xf32, #tpu.memory_space<vmem>>, %arg6: memref<128x128xbf16, #tpu.memory_space<vmem>>, %arg7: memref<1x128xf32, #tpu.memory_space<vmem>>, %arg8: memref<128x128xbf16, #tpu.memory_space<vmem>>, %arg9: memref<1x128xf32, #tpu.memory_space<vmem>>, %arg10: memref<128x128xbf16, #tpu.memory_space<vmem>>, %arg11: memref<1x128xf32, #tpu.memory_space<vmem>>, %arg12: memref<128x128xbf16, #tpu.memory_space<vmem>>, %arg13: memref<128x128xbf16, #tpu.memory_space<vmem>>, %arg14: memref<1x128xf32, #tpu.memory_space<vmem>>, %arg15: memref<128x128xbf16, #tpu.memory_space<vmem>>, %arg16: memref<1x128xf32, #tpu.memory_space<vmem>>, %arg17: memref<8x128xf32, #tpu.memory_space<vmem>>, %arg18: memref<8x128xf32, #tpu.memory_space<vmem>>) attributes {dimension_semantics = [#tpu.dimension_semantics<parallel>, #tpu.dimension_semantics<arbitrary>], iteration_bounds = array<i64: 1, 1>, scalar_prefetch = 0 : i64, scratch_operands = 1 : i64, tpu.core_type = #tpu.core_type<tc>, window_params = [{transform_indices = @transform_0, window_bounds = array<i64: 8, 128>}, {pipeline_mode = #tpu.pipeline_mode<double_buffered>, transform_indices = @transform_1, window_bounds = array<i64: 8, 128>}, {pipeline_mode = #tpu.pipeline_mode<synchronous>, transform_indices = @transform_2, window_bounds = array<i64: 128, 128>}, {pipeline_mode = #tpu.pipeline_mode<synchronous>, transform_indices = @transform_3, window_bounds = array<i64: 1, 128>}, {pipeline_mode = #tpu.pipeline_mode<synchronous>, transform_indices = @transform_4, window_bounds = array<i64: 128, 128>}, {pipeline_mode = #tpu.pipeline_mode<synchronous>, transform_indices = @transform_5, window_bounds = array<i64: 1, 128>}, {pipeline_mode = #tpu.pipeline_mode<synchronous>, transform_indices = @transform_6, window_bounds = array<i64: 128, 128>}, {pipeline_mode = #tpu.pipeline_mode<synchronous>, transform_indices = @transform_7, window_bounds = array<i64: 1, 128>}, {pipeline_mode = #tpu.pipeline_mode<synchronous>, transform_indices = @transform_8, window_bounds = array<i64: 128, 128>}, {pipeline_mode = #tpu.pipeline_mode<synchronous>, transform_indices = @transform_9, window_bounds = array<i64: 1, 128>}, {pipeline_mode = #tpu.pipeline_mode<synchronous>, transform_indices = @transform_10, window_bounds = array<i64: 128, 128>}, {pipeline_mode = #tpu.pipeline_mode<synchronous>, transform_indices = @transform_11, window_bounds = array<i64: 128, 128>}, {pipeline_mode = #tpu.pipeline_mode<synchronous>, transform_indices = @transform_12, window_bounds = array<i64: 1, 128>}, {pipeline_mode = #tpu.pipeline_mode<synchronous>, transform_indices = @transform_13, window_bounds = array<i64: 128, 128>}, {pipeline_mode = #tpu.pipeline_mode<synchronous>, transform_indices = @transform_14, window_bounds = array<i64: 1, 128>}, {transform_indices = @transform_15, window_bounds = array<i64: 8, 128>}]} {
    %c0 = arith.constant 0 : index
    %c0_0 = arith.constant 0 : index
    %0 = vector.load %arg8[%c0, %c0_0] : memref<128x128xbf16, #tpu.memory_space<vmem>>, vector<128x128xbf16>
    %c0_1 = arith.constant 0 : index
    %c0_2 = arith.constant 0 : index
    %1 = vector.load %arg3[%c0_1, %c0_2] : memref<8x128xf32, #tpu.memory_space<vmem>>, vector<8x128xf32>
    %2 = arith.truncf %1 : vector<8x128xf32> to vector<8x128xbf16>
    %cst = arith.constant dense<0.000000e+00> : vector<8x128xf32>
    %3 = tpu.matmul %2, %0, %cst {dimension_numbers = #tpu.dot_dimension_numbers<[1], [0], [0], [1], [0, 0, 1, 1], [], []>} : vector<8x128xbf16>, vector<128x128xbf16>, vector<8x128xf32> -> vector<8x128xf32>
    %c0_i32 = arith.constant 0 : i32
    %4 = arith.cmpi eq, %arg1, %c0_i32 : i32
    %5 = arith.extui %4 : i1 to i32
    %c0_i32_3 = arith.constant 0 : i32
    %6 = arith.cmpi ne, %5, %c0_i32_3 : i32
    scf.if %6 {
      %c0_8 = arith.constant 0 : index
      %c0_9 = arith.constant 0 : index
      %13 = vector.load %arg18[%c0_8, %c0_9] : memref<8x128xf32, #tpu.memory_space<vmem>>, vector<8x128xf32>
      tpu.vector_store %arg18[%c0_8, %c0_9], %3 {strides = array<i32>} : memref<8x128xf32, #tpu.memory_space<vmem>>, vector<8x128xf32>,
    } else {
    }
    %c0_i32_4 = arith.constant 0 : i32
    %7 = arith.cmpi ne, %arg1, %c0_i32_4 : i32
    %8 = arith.extui %7 : i1 to i32
    %c0_i32_5 = arith.constant 0 : i32
    %9 = arith.cmpi ne, %8, %c0_i32_5 : i32
    scf.if %9 {
      %c0_8 = arith.constant 0 : index
      %c0_9 = arith.constant 0 : index
      %13 = vector.load %arg18[%c0_8, %c0_9] : memref<8x128xf32, #tpu.memory_space<vmem>>, vector<8x128xf32>
      %14 = arith.addf %13, %3 : vector<8x128xf32>
      %c0_10 = arith.constant 0 : index
      %c0_11 = arith.constant 0 : index
      %15 = vector.load %arg18[%c0_10, %c0_11] : memref<8x128xf32, #tpu.memory_space<vmem>>, vector<8x128xf32>
      tpu.vector_store %arg18[%c0_10, %c0_11], %14 {strides = array<i32>} : memref<8x128xf32, #tpu.memory_space<vmem>>, vector<8x128xf32>,
    } else {
    }
    %c0_i32_6 = arith.constant 0 : i32
    %10 = arith.cmpi eq, %arg1, %c0_i32_6 : i32
    %11 = arith.extui %10 : i1 to i32
    %c0_i32_7 = arith.constant 0 : i32
    %12 = arith.cmpi ne, %11, %c0_i32_7 : i32
    scf.if %12 {
      %c0_8 = arith.constant 0 : index
      %c0_9 = arith.constant 0 : index
      %13 = vector.load %arg2[%c0_8, %c0_9] : memref<8x128xf32, #tpu.memory_space<vmem>>, vector<8x128xf32>
      %14 = arith.truncf %13 : vector<8x128xf32> to vector<8x128xbf16>
      %c0_10 = arith.constant 0 : index
      %c0_11 = arith.constant 0 : index
      %15 = vector.load %arg4[%c0_10, %c0_11] : memref<128x128xbf16, #tpu.memory_space<vmem>>, vector<128x128xbf16>
      %cst_12 = arith.constant dense<0.000000e+00> : vector<8x128xf32>
      %16 = tpu.matmul %14, %15, %cst_12 {dimension_numbers = #tpu.dot_dimension_numbers<[1], [0], [0], [1], [0, 0, 1, 1], [], []>} : vector<8x128xbf16>, vector<128x128xbf16>, vector<8x128xf32> -> vector<8x128xf32>
      %c0_13 = arith.constant 0 : index
      %c0_14 = arith.constant 0 : index
      %17 = vector.load %arg5[%c0_13, %c0_14] : memref<1x128xf32, #tpu.memory_space<vmem>>, vector<1x128xf32>
      %18 = vector.broadcast %17 : vector<1x128xf32> to vector<8x128xf32>
      %19 = arith.addf %16, %18 : vector<8x128xf32>
      %cst_15 = arith.constant 0.000000e+00 : f32
      %20 = vector.broadcast %cst_15 : f32 to vector<8x128xf32>
      %21 = arith.maximumf %19, %20 : vector<8x128xf32>
      %22 = arith.truncf %21 : vector<8x128xf32> to vector<8x128xbf16>
      %c0_16 = arith.constant 0 : index
      %c0_17 = arith.constant 0 : index
      %23 = vector.load %arg6[%c0_16, %c0_17] : memref<128x128xbf16, #tpu.memory_space<vmem>>, vector<128x128xbf16>
      %cst_18 = arith.constant dense<0.000000e+00> : vector<8x128xf32>
      %24 = tpu.matmul %22, %23, %cst_18 {dimension_numbers = #tpu.dot_dimension_numbers<[1], [0], [0], [1], [0, 0, 1, 1], [], []>} : vector<8x128xbf16>, vector<128x128xbf16>, vector<8x128xf32> -> vector<8x128xf32>
      %c0_19 = arith.constant 0 : index
      %c0_20 = arith.constant 0 : index
      %25 = vector.load %arg7[%c0_19, %c0_20] : memref<1x128xf32, #tpu.memory_space<vmem>>, vector<1x128xf32>
      %26 = vector.broadcast %25 : vector<1x128xf32> to vector<8x128xf32>
      %27 = arith.addf %24, %26 : vector<8x128xf32>
      %c0_21 = arith.constant 0 : index
      %c0_22 = arith.constant 0 : index
      %28 = vector.load %arg18[%c0_21, %c0_22] : memref<8x128xf32, #tpu.memory_space<vmem>>, vector<8x128xf32>
      %c0_23 = arith.constant 0 : index
      %c0_24 = arith.constant 0 : index
      %29 = vector.load %arg9[%c0_23, %c0_24] : memref<1x128xf32, #tpu.memory_space<vmem>>, vector<1x128xf32>
      %30 = vector.broadcast %29 : vector<1x128xf32> to vector<8x128xf32>
      %31 = arith.addf %28, %30 : vector<8x128xf32>
      %cst_25 = arith.constant 0.000000e+00 : f32
      %32 = vector.broadcast %cst_25 : f32 to vector<8x128xf32>
      %33 = arith.maximumf %31, %32 : vector<8x128xf32>
      %34 = arith.truncf %33 : vector<8x128xf32> to vector<8x128xbf16>
      %c0_26 = arith.constant 0 : index
      %c0_27 = arith.constant 0 : index
      %35 = vector.load %arg10[%c0_26, %c0_27] : memref<128x128xbf16, #tpu.memory_space<vmem>>, vector<128x128xbf16>
      %cst_28 = arith.constant dense<0.000000e+00> : vector<8x128xf32>
      %36 = tpu.matmul %34, %35, %cst_28 {dimension_numbers = #tpu.dot_dimension_numbers<[1], [0], [0], [1], [0, 0, 1, 1], [], []>} : vector<8x128xbf16>, vector<128x128xbf16>, vector<8x128xf32> -> vector<8x128xf32>
      %c0_29 = arith.constant 0 : index
      %c0_30 = arith.constant 0 : index
      %37 = vector.load %arg11[%c0_29, %c0_30] : memref<1x128xf32, #tpu.memory_space<vmem>>, vector<1x128xf32>
      %38 = vector.broadcast %37 : vector<1x128xf32> to vector<8x128xf32>
      %39 = arith.addf %36, %38 : vector<8x128xf32>
      %40 = arith.truncf %27 : vector<8x128xf32> to vector<8x128xbf16>
      %c0_31 = arith.constant 0 : index
      %c0_32 = arith.constant 0 : index
      %41 = vector.load %arg12[%c0_31, %c0_32] : memref<128x128xbf16, #tpu.memory_space<vmem>>, vector<128x128xbf16>
      %cst_33 = arith.constant dense<0.000000e+00> : vector<8x128xf32>
      %42 = tpu.matmul %40, %41, %cst_33 {dimension_numbers = #tpu.dot_dimension_numbers<[1], [0], [0], [1], [0, 0, 1, 1], [], []>} : vector<8x128xbf16>, vector<128x128xbf16>, vector<8x128xf32> -> vector<8x128xf32>
      %43 = arith.truncf %39 : vector<8x128xf32> to vector<8x128xbf16>
      %c0_34 = arith.constant 0 : index
      %c0_35 = arith.constant 0 : index
      %44 = vector.load %arg13[%c0_34, %c0_35] : memref<128x128xbf16, #tpu.memory_space<vmem>>, vector<128x128xbf16>
      %cst_36 = arith.constant dense<0.000000e+00> : vector<8x128xf32>
      %45 = tpu.matmul %43, %44, %cst_36 {dimension_numbers = #tpu.dot_dimension_numbers<[1], [0], [0], [1], [0, 0, 1, 1], [], []>} : vector<8x128xbf16>, vector<128x128xbf16>, vector<8x128xf32> -> vector<8x128xf32>
      %46 = arith.addf %42, %45 : vector<8x128xf32>
      %c0_37 = arith.constant 0 : index
      %c0_38 = arith.constant 0 : index
      %47 = vector.load %arg14[%c0_37, %c0_38] : memref<1x128xf32, #tpu.memory_space<vmem>>, vector<1x128xf32>
      %48 = vector.broadcast %47 : vector<1x128xf32> to vector<8x128xf32>
      %49 = arith.addf %46, %48 : vector<8x128xf32>
      %cst_39 = arith.constant 0.000000e+00 : f32
      %50 = vector.broadcast %cst_39 : f32 to vector<8x128xf32>
      %51 = arith.maximumf %49, %50 : vector<8x128xf32>
      %52 = arith.truncf %51 : vector<8x128xf32> to vector<8x128xbf16>
      %c0_40 = arith.constant 0 : index
      %c0_41 = arith.constant 0 : index
      %53 = vector.load %arg15[%c0_40, %c0_41] : memref<128x128xbf16, #tpu.memory_space<vmem>>, vector<128x128xbf16>
      %cst_42 = arith.constant dense<0.000000e+00> : vector<8x128xf32>
      %54 = tpu.matmul %52, %53, %cst_42 {dimension_numbers = #tpu.dot_dimension_numbers<[1], [0], [0], [1], [0, 0, 1, 1], [], []>} : vector<8x128xbf16>, vector<128x128xbf16>, vector<8x128xf32> -> vector<8x128xf32>
      %c0_43 = arith.constant 0 : index
      %c0_44 = arith.constant 0 : index
      %55 = vector.load %arg16[%c0_43, %c0_44] : memref<1x128xf32, #tpu.memory_space<vmem>>, vector<1x128xf32>
      %56 = vector.broadcast %55 : vector<1x128xf32> to vector<8x128xf32>
      %57 = arith.addf %54, %56 : vector<8x128xf32>
      %c0_45 = arith.constant 0 : index
      %c0_46 = arith.constant 0 : index
      %58 = vector.load %arg17[%c0_45, %c0_46] : memref<8x128xf32, #tpu.memory_space<vmem>>, vector<8x128xf32>
      tpu.vector_store %arg17[%c0_45, %c0_46], %57 {strides = array<i32>} : memref<8x128xf32, #tpu.memory_space<vmem>>, vector<8x128xf32>,
    } else {
    }
    return
  }
  func.func @transform_0(%arg0: i32, %arg1: i32) -> (i32, i32) {
    %c0_i32 = arith.constant 0 : i32
    %c0_i32_0 = arith.constant 0 : i32
    return %arg0, %c0_i32 : i32, i32
  }
  func.func @transform_1(%arg0: i32, %arg1: i32) -> (i32, i32) {
    %c0_i32 = arith.constant 0 : i32
    return %arg0, %arg1 : i32, i32
  }
  func.func @transform_2(%arg0: i32, %arg1: i32) -> (i32, i32) {
    %c0_i32 = arith.constant 0 : i32
    %c0_i32_0 = arith.constant 0 : i32
    %c0_i32_1 = arith.constant 0 : i32
    return %c0_i32, %c0_i32_0 : i32, i32
  }
  func.func @transform_3(%arg0: i32, %arg1: i32) -> (i32, i32) {
    %c0_i32 = arith.constant 0 : i32
    %c0_i32_0 = arith.constant 0 : i32
    %c0_i32_1 = arith.constant 0 : i32
    return %c0_i32, %c0_i32_0 : i32, i32
  }
  func.func @transform_4(%arg0: i32, %arg1: i32) -> (i32, i32) {
    %c0_i32 = arith.constant 0 : i32
    %c0_i32_0 = arith.constant 0 : i32
    %c0_i32_1 = arith.constant 0 : i32
    return %c0_i32, %c0_i32_0 : i32, i32
  }
  func.func @transform_5(%arg0: i32, %arg1: i32) -> (i32, i32) {
    %c0_i32 = arith.constant 0 : i32
    %c0_i32_0 = arith.constant 0 : i32
    %c0_i32_1 = arith.constant 0 : i32
    return %c0_i32, %c0_i32_0 : i32, i32
  }
  func.func @transform_6(%arg0: i32, %arg1: i32) -> (i32, i32) {
    %c0_i32 = arith.constant 0 : i32
    %c0_i32_0 = arith.constant 0 : i32
    %c0_i32_1 = arith.constant 0 : i32
    return %c0_i32, %c0_i32_0 : i32, i32
  }
  func.func @transform_7(%arg0: i32, %arg1: i32) -> (i32, i32) {
    %c0_i32 = arith.constant 0 : i32
    %c0_i32_0 = arith.constant 0 : i32
    %c0_i32_1 = arith.constant 0 : i32
    return %c0_i32, %c0_i32_0 : i32, i32
  }
  func.func @transform_8(%arg0: i32, %arg1: i32) -> (i32, i32) {
    %c0_i32 = arith.constant 0 : i32
    %c0_i32_0 = arith.constant 0 : i32
    %c0_i32_1 = arith.constant 0 : i32
    return %c0_i32, %c0_i32_0 : i32, i32
  }
  func.func @transform_9(%arg0: i32, %arg1: i32) -> (i32, i32) {
    %c0_i32 = arith.constant 0 : i32
    %c0_i32_0 = arith.constant 0 : i32
    %c0_i32_1 = arith.constant 0 : i32
    return %c0_i32, %c0_i32_0 : i32, i32
  }
  func.func @transform_10(%arg0: i32, %arg1: i32) -> (i32, i32) {
    %c0_i32 = arith.constant 0 : i32
    %c0_i32_0 = arith.constant 0 : i32
    %c0_i32_1 = arith.constant 0 : i32
    return %c0_i32, %c0_i32_0 : i32, i32
  }
  func.func @transform_11(%arg0: i32, %arg1: i32) -> (i32, i32) {
    %c0_i32 = arith.constant 0 : i32
    %c0_i32_0 = arith.constant 0 : i32
    %c0_i32_1 = arith.constant 0 : i32
    return %c0_i32, %c0_i32_0 : i32, i32
  }
  func.func @transform_12(%arg0: i32, %arg1: i32) -> (i32, i32) {
    %c0_i32 = arith.constant 0 : i32
    %c0_i32_0 = arith.constant 0 : i32
    %c0_i32_1 = arith.constant 0 : i32
    return %c0_i32, %c0_i32_0 : i32, i32
  }
  func.func @transform_13(%arg0: i32, %arg1: i32) -> (i32, i32) {
    %c0_i32 = arith.constant 0 : i32
    %c0_i32_0 = arith.constant 0 : i32
    %c0_i32_1 = arith.constant 0 : i32
    return %c0_i32, %c0_i32_0 : i32, i32
  }
  func.func @transform_14(%arg0: i32, %arg1: i32) -> (i32, i32) {
    %c0_i32 = arith.constant 0 : i32
    %c0_i32_0 = arith.constant 0 : i32
    %c0_i32_1 = arith.constant 0 : i32
    return %c0_i32, %c0_i32_0 : i32, i32
  }
  func.func @transform_15(%arg0: i32, %arg1: i32) -> (i32, i32) {
    %c0_i32 = arith.constant 0 : i32
    %c0_i32_0 = arith.constant 0 : i32
    return %arg0, %c0_i32 : i32, i32
  }
}

</mosaic_0001>

<bundles_post_ra>
// kernel: recommender_forward.1
= control target key start
LH: loop header
LB: loop body
LE: loop exit
PB: predicated region body
PF: predicated region fallthrough
CT: control target
= control target key end

     0   :  { %v1213_v1 = vmov 0.0   ;;  %vm1214_vm0 = vmmov 0   ;;  %s1561_s0 = inlined_call_operand.vmem [shape: f32[8,128], index: 0, kind: input, shape index: {}]   ;;  %s1562_s1 = inlined_call_operand.vmem [shape: f32[8,128], index: 1, kind: input, shape index: {}]   ;;  %s1563_s2 = inlined_call_operand.vmem [shape: bf16[128,128], index: 2, kind: input, shape index: {}]   ;;  %s1564_s3 = inlined_call_operand.vmem [shape: f32[1,128], index: 3, kind: input, shape index: {}]   ;;  %s1565_s4 = inlined_call_operand.vmem [shape: bf16[128,128], index: 4, kind: input, shape index: {}]   ;;  %s1566_s5 = inlined_call_operand.vmem [shape: f32[1,128], index: 5, kind: input, shape index: {}]   ;;  %s1567_s6 = inlined_call_operand.vmem [shape: bf16[128,128], index: 6, kind: input, shape index: {}]   ;;  %s1568_s7 = inlined_call_operand.vmem [shape: f32[1,128], index: 7, kind: input, shape index: {}]   ;;  %s1569_s8 = inlined_call_operand.vmem [shape: bf16[128,128], index: 8, kind: input, shape index: {}]   ;;  %s1570_s9 = inlined_call_operand.vmem [shape: f32[1,128], index: 9, kind: input, shape index: {}]   ;;  %s1571_s10 = inlined_call_operand.vmem [shape: bf16[128,128], index: 10, kind: input, shape index: {}]   ;;  %s1572_s11 = inlined_call_operand.vmem [shape: bf16[128,128], index: 11, kind: input, shape index: {}]   ;;  %s1573_s12 = inlined_call_operand.vmem [shape: f32[1,128], index: 12, kind: input, shape index: {}]   ;;  %s1574_s13 = inlined_call_operand.vmem [shape: bf16[128,128], index: 13, kind: input, shape index: {}]   ;;  %s1575_s14 = inlined_call_operand.vmem [shape: f32[1,128], index: 14, kind: input, shape index: {}]   ;;  %s1576_s15 = inlined_call_operand.hbm [shape: f32[8,128], index: 15, kind: output, shape index: {}]  }
   0x1   :  { %v1135_v0 = vld [vmem:[%s1567_s6 + $0x38] sm:$0xff]   ;;  %992 = vmatprep.subr.bf16.mxu0 %v1213_v1  ;;  %1012 = vmatprep.subr.bf16.mxu1 %v1213_v1  ;;  %v1137_v3 = vld [vmem:[%s1567_s6 + $0x30] sm:$0xff]   ;;  %v1139_v5 = vld [vmem:[%s1567_s6 + $0x28] sm:$0xff]  }
   0x2   :  { %v1136_v2 = vld [vmem:[%s1563_s2 + $0x38] sm:$0xff]   ;;  %993 = vmatpush3.bf16.msra.mxu0 %v1135_v0  ;;  %1008 = vmatprep.mubr.msk.bf16.mxu0 %vm1214_vm0, %v1213_v1  ;;  %v1138_v4 = vld [vmem:[%s1563_s2 + $0x30] sm:$0xff]   ;;  %v1140_v6 = vld [vmem:[%s1563_s2 + $0x28] sm:$0xff]  }
   0x3   :  { %1013 = vmatpush3.bf16.msra.mxu1 %v1136_v2  ;;  %994 = vmatprep.subr.bf16.mxu0 %v1213_v1  ;;  %v1141_v7 = vld [vmem:[%s1567_s6 + $0x20] sm:$0xff]   ;;  %v1143_v9 = vld [vmem:[%s1567_s6 + $0x18] sm:$0xff]   ;;  %v1145_v11 = vld [vmem:[%s1567_s6 + $0x10] sm:$0xff]  }
   0x4   :  { %1014 = vmatprep.subr.bf16.mxu1 %v1213_v1  ;;  %1028 = vmatprep.mubr.msk.bf16.mxu1 %vm1214_vm0, %v1213_v1  ;;  %v1142_v8 = vld [vmem:[%s1563_s2 + $0x20] sm:$0xff]   ;;  %v1144_v10 = vld [vmem:[%s1563_s2 + $0x18] sm:$0xff]   ;;  %v1146_v12 = vld [vmem:[%s1563_s2 + $0x10] sm:$0xff]  }
   0x5   :  { %v1147_v13 = vld [vmem:[%s1567_s6 + $0x8] sm:$0xff]   ;;  %v1149_v15 = vld [vmem:[%s1567_s6] sm:$0xff]   ;;  %v1151_v19 = vld [vmem:[%s1565_s4 + $0x38] sm:$0xff]  }
   0x6   :  { %995 = vmatpush3.bf16.msra.mxu0 %v1137_v3  ;;  %v1148_v14 = vld [vmem:[%s1563_s2 + $0x8] sm:$0xff]   ;;  %v1150_v16 = vld [vmem:[%s1563_s2] sm:$0xff]   ;;  %v1152_v21 = vld [vmem:[%s1569_s8 + $0x38] sm:$0xff]  }
   0x7   :  { %1015 = vmatpush3.bf16.msra.mxu1 %v1138_v4  ;;  %996 = vmatprep.subr.bf16.mxu0 %v1213_v1  ;;  %v68_v17 = vld [vmem:[%s1562_s1] sm:$0xff]  ;;  %v1153_v23 = vld [vmem:[%s1565_s4 + $0x30] sm:$0xff]   ;;  %v1155_v25 = vld [vmem:[%s1565_s4 + $0x28] sm:$0xff]  }
   0x8   :  { %1016 = vmatprep.subr.bf16.mxu1 %v1213_v1  ;;  %v173_v18 = vld [vmem:[%s1561_s0] sm:$0xff]  ;;  %v69_v20 = vpack.c.bf16 %v68_v17, %v68_v17  ;;  %v1154_v24 = vld [vmem:[%s1569_s8 + $0x30] sm:$0xff]   ;;  %v1156_v26 = vld [vmem:[%s1569_s8 + $0x28] sm:$0xff]  }
   0x9   :  { %v174_v22 = vpack.c.bf16 %v173_v18, %v173_v18  ;;  %v1157_v27 = vld [vmem:[%s1565_s4 + $0x20] sm:$0xff]   ;;  %v1159_v29 = vld [vmem:[%s1565_s4 + $0x18] sm:$0xff]  }
   0xa   :  { %997 = vmatpush3.bf16.msra.mxu0 %v1139_v5  ;;  %v1158_v28 = vld [vmem:[%s1569_s8 + $0x20] sm:$0xff]   ;;  %v1160_v30 = vld [vmem:[%s1569_s8 + $0x18] sm:$0xff]  }
   0xb   :  { %1017 = vmatpush3.bf16.msra.mxu1 %v1140_v6  ;;  %998 = vmatprep.subr.bf16.mxu0 %v1213_v1 }
   0xc   :  { %1018 = vmatprep.subr.bf16.mxu1 %v1213_v1 }
   0xe   :  { %999 = vmatpush3.bf16.msra.mxu0 %v1141_v7 }
   0xf   :  { %1019 = vmatpush3.bf16.msra.mxu1 %v1142_v8  ;;  %1000 = vmatprep.subr.bf16.mxu0 %v1213_v1 }
  0x10   :  { %1020 = vmatprep.subr.bf16.mxu1 %v1213_v1 }
  0x12   :  { %1001 = vmatpush3.bf16.msra.mxu0 %v1143_v9 }
  0x13   :  { %1021 = vmatpush3.bf16.msra.mxu1 %v1144_v10  ;;  %1002 = vmatprep.subr.bf16.mxu0 %v1213_v1 }
  0x14   :  { %1022 = vmatprep.subr.bf16.mxu1 %v1213_v1 }
  0x16   :  { %1003 = vmatpush3.bf16.msra.mxu0 %v1145_v11 }
  0x17   :  { %1023 = vmatpush3.bf16.msra.mxu1 %v1146_v12  ;;  %1004 = vmatprep.subr.bf16.mxu0 %v1213_v1 }
  0x18   :  { %1024 = vmatprep.subr.bf16.mxu1 %v1213_v1 }
  0x1a   :  { %1005 = vmatpush3.bf16.msra.mxu0 %v1147_v13 }
  0x1b   :  { %1025 = vmatpush3.bf16.msra.mxu1 %v1148_v14  ;;  %1006 = vmatprep.subr.bf16.mxu0 %v1213_v1 }
  0x1c   :  { %1026 = vmatprep.subr.bf16.mxu1 %v1213_v1 }
  0x1e   :  { %1007 = vmatpush3.bf16.msra.mxu0 %v1149_v15 }
  0x1f   :  { %1027 = vmatpush3.bf16.msra.mxu1 %v1150_v16  ;;  %1032 = vmatprep.subr.bf16.mxu0 %v1213_v1 }
  0x20   :  { %1052 = vmatprep.subr.bf16.mxu1 %v1213_v1 }
  0x21   :  { %1009 = vmatmul.mubr.bf16.vlgmr.msra.gmra.mxu0 %v69_v20 }
  0x22   :  { %1029 = vmatmul.mubr.bf16.vlgmr.msra.gmra.mxu1 %v174_v22  ;;  %1033 = vmatpush3.bf16.msra.mxu0 %v1151_v19 }
  0x23   :  { %1053 = vmatpush3.bf16.msra.mxu1 %v1152_v21  ;;  %1034 = vmatprep.subr.bf16.mxu0 %v1213_v1 }
  0x24   :  { %1054 = vmatprep.subr.bf16.mxu1 %v1213_v1  ;;  %1048 = vmatprep.mubr.msk.bf16.mxu0 %vm1214_vm0, %v1213_v1 }
  0x25   :  { %1068 = vmatprep.mubr.msk.bf16.mxu1 %vm1214_vm0, %v1213_v1 }
  0x26   :  { %1035 = vmatpush3.bf16.msra.mxu0 %v1153_v23 }
  0x27   :  { %1055 = vmatpush3.bf16.msra.mxu1 %v1154_v24  ;;  %1036 = vmatprep.subr.bf16.mxu0 %v1213_v1 }
  0x28   :  { %1056 = vmatprep.subr.bf16.mxu1 %v1213_v1 }
  0x2a   :  { %1037 = vmatpush3.bf16.msra.mxu0 %v1155_v25 }
  0x2b   :  { %1057 = vmatpush3.bf16.msra.mxu1 %v1156_v26  ;;  %1038 = vmatprep.subr.bf16.mxu0 %v1213_v1 }
  0x2c   :  { %1058 = vmatprep.subr.bf16.mxu1 %v1213_v1 }
  0x2e   :  { %1039 = vmatpush3.bf16.msra.mxu0 %v1157_v27 }
  0x2f   :  { %1059 = vmatpush3.bf16.msra.mxu1 %v1158_v28  ;;  %1040 = vmatprep.subr.bf16.mxu0 %v1213_v1 }
  0x30   :  { %20 = vsyncpa [#allocation4], 0  ;;  %1060 = vmatprep.subr.bf16.mxu1 %v1213_v1  ;;  %v1161_v31 = vld [vmem:[%s1565_s4 + $0x10] sm:$0xff]   ;;  %v1163_v33 = vld [vmem:[%s1565_s4 + $0x8] sm:$0xff]   ;;  %s1215_s23 = smov [#allocation3]  }
  0x31   :  { %v1162_v32 = vld [vmem:[%s1569_s8 + $0x10] sm:$0xff]   ;;  %v1164_v34 = vld [vmem:[%s1569_s8 + $0x8] sm:$0xff]   ;;  %v1165_v35 = vld [vmem:[%s1565_s4] sm:$0xff]   ;;  %s859_s24 = sshll.u32 %s1215_s23, 4  ;;  %s860_s24 = int_to_ptr.vmem [resolvable:$true] %s859_s24 }
  0x32   :  { %1041 = vmatpush3.bf16.msra.mxu0 %v1159_v29  ;;  %v1166_v36 = vld [vmem:[%s1569_s8] sm:$0xff]   ;;  %v1168_v48 = vld [vmem:[%s1571_s10 + $0x38] sm:$0xff]   ;;  %v1170_v55 = vld [vmem:[%s1571_s10 + $0x30] sm:$0xff]   ;;  %p1196_p1 = scmp.lt.s32.totalorder %s860_s24, %s860_s24 }
  0x33   :  { %1061 = vmatpush3.bf16.msra.mxu1 %v1160_v30  ;;  %1042 = vmatprep.subr.bf16.mxu0 %v1213_v1  ;;  %v893_v37 = vld [vmem:[%s1568_s7] ss:$0 sm:$0xff]  ;;  %v1167_v51 = vld [vmem:[%s1572_s11 + $0x38] sm:$0xff]   ;;  %v1169_v56 = vld [vmem:[%s1572_s11 + $0x30] sm:$0xff]  }
  0x34   :  { %1062 = vmatprep.subr.bf16.mxu1 %v1213_v1  ;;  %v875_v38 = vld [vmem:[%s1564_s3] ss:$0 sm:$0xff]  ;;  %v1172_v57 = vld [vmem:[%s1571_s10 + $0x28] sm:$0xff]   ;;  %v1176_v61 = vld [vmem:[%s1571_s10 + $0x18] sm:$0xff]  }
  0x35   :  { %v1171_v58 = vld [vmem:[%s1572_s11 + $0x28] sm:$0xff]   ;;  %v1174_v59 = vld [vmem:[%s1571_s10 + $0x20] sm:$0xff]   ;;  %v1175_v62 = vld [vmem:[%s1572_s11 + $0x18] sm:$0xff]  }
  0x36   :  { %1043 = vmatpush3.bf16.msra.mxu0 %v1161_v31  ;;  %v1173_v60 = vld [vmem:[%s1572_s11 + $0x20] sm:$0xff]   ;;  %v1178_v63 = vld [vmem:[%s1571_s10 + $0x10] sm:$0xff]   ;;  %v1180_v2 = vld [vmem:[%s1571_s10 + $0x8] sm:$0xff]  }
  0x37   :  { %1063 = vmatpush3.bf16.msra.mxu1 %v1162_v32  ;;  %1044 = vmatprep.subr.bf16.mxu0 %v1213_v1  ;;  %v1177_v0 = vld [vmem:[%s1572_s11 + $0x10] sm:$0xff]   ;;  %v1179_v3 = vld [vmem:[%s1572_s11 + $0x8] sm:$0xff]   ;;  %v1181_v4 = vld [vmem:[%s1572_s11] sm:$0xff]  }
  0x38   :  { %1064 = vmatprep.subr.bf16.mxu1 %v1213_v1  ;;  %v1182_v5 = vld [vmem:[%s1571_s10] sm:$0xff]   ;;  %v1183_v13 = vld [vmem:[%s1574_s13 + $0x38] sm:$0xff]   ;;  %v1184_v20 = vld [vmem:[%s1574_s13 + $0x30] sm:$0xff]  }
  0x39   :  { %v894_v6 = vld [vmem:[%s1570_s9] ss:$0 sm:$0xff]  ;;  %v1185_v22 = vld [vmem:[%s1574_s13 + $0x28] sm:$0xff]   ;;  %v1187_v24 = vld [vmem:[%s1574_s13 + $0x18] sm:$0xff]  }
  0x3a   :  { %1045 = vmatpush3.bf16.msra.mxu0 %v1163_v33  ;;  %v884_v7 = vld [vmem:[%s1566_s5] ss:$0 sm:$0xff]  ;;  %v1188_v25 = vld [vmem:[%s1574_s13 + $0x10] sm:$0xff]   ;;  %v1189_v26 = vld [vmem:[%s1574_s13 + $0x8] sm:$0xff]  }
  0x3b   :  { %1065 = vmatpush3.bf16.msra.mxu1 %v1164_v34  ;;  %1046 = vmatprep.subr.bf16.mxu0 %v1213_v1  ;;  %v1186_v23 = vld [vmem:[%s1574_s13 + $0x20] sm:$0xff]  }
  0x3c   :  { %1066 = vmatprep.subr.bf16.mxu1 %v1213_v1  ;;  %v1190_v27 = vld [vmem:[%s1574_s13] sm:$0xff]  }
  0x3d   :  { %v919_v30 = vld [vmem:[%s1573_s12] ss:$0 sm:$0xff]  ;;  %s1191_s12 = scalar_lea.vmem %s860_s24, 128 }
  0x3e   :  { %1047 = vmatpush3.bf16.msra.mxu0 %v1165_v35  ;;  %p1192_p0 = scmp.ne.s32.totalorder %s860_s24, %s1191_s12  ;;  %p1197_p2 = scmp.lt.s32.totalorder %s1191_s12, %s1191_s12 }
  0x3f   :  { %1067 = vmatpush3.bf16.msra.mxu1 %v1166_v36  ;;  %1072 = vmatprep.subr.bf16.mxu0 %v1213_v1 }
  0x40   :  { %1092 = vmatprep.subr.bf16.mxu1 %v1213_v1  ;;  %p1198_p3 = por %p1197_p2, %p1196_p1 }
  0x42   :  { %p1199_p4 = pnand %p1198_p3, %p1192_p0 }
  0xe1   :  { %v152_v39 = vpop.f32.mrf.mxu0 }
  0xe2   :  { %v407_v40 = vadd.f32 %v893_v37, %v152_v39  ;;  %v280_v41 = vpop.f32.mrf.mxu1 }
  0xe3   :  { %v281_v42 = vadd.f32 %v875_v38, %v280_v41  ;;  %v1010_v43 = vpop.f32.mrf.mxu0 }
  0xe4   :  { %v408_v44 = vmax.f32 %v407_v40, 0.0  ;;  %v1030_v45 = vpop.f32.mrf.mxu1  ;;  %v920_v40 = vld [vmem:[%s1575_s14] ss:$0 sm:$0xff] }
  0xe5   :  { %v286_v46 = vmax.f32 %v281_v42, 0.0  ;;  %v155_v47 = vpop.f32.mrf.mxu0 }
  0xe6   :  { %v409_v49 = vpack.c.bf16 %v408_v44, %v408_v44  ;;  %v283_v50 = vpop.f32.mrf.mxu1 }
  0xe7   :  { %v287_v52 = vpack.c.bf16 %v286_v46, %v286_v46  ;;  %v1011_v53 = vpop.f32.mrf.mxu0 }
  0xe8   :  { %v1031_v54 = vpop.f32.mrf.mxu1  ;;  %1069 = vmatmul.mubr.bf16.vlgmr.msra.gmra.mxu1 %v409_v49 }
  0xe9   :  { %1049 = vmatmul.mubr.bf16.vlgmr.msra.gmra.mxu0 %v287_v52  ;;  %1093 = vmatpush3.bf16.msra.mxu1 %v1168_v48 }
  0xea   :  { %1073 = vmatpush3.bf16.msra.mxu0 %v1167_v51  ;;  %1094 = vmatprep.subr.bf16.mxu1 %v1213_v1 }
  0xeb   :  { %1074 = vmatprep.subr.bf16.mxu0 %v1213_v1  ;;  %1088 = vmatprep.mubr.msk.bf16.mxu0 %vm1214_vm0, %v1213_v1 }
  0xec   :  { %1108 = vmatprep.mubr.msk.bf16.mxu1 %vm1214_vm0, %v1213_v1 }
  0xed   :  { %1095 = vmatpush3.bf16.msra.mxu1 %v1170_v55 }
  0xee   :  { %1075 = vmatpush3.bf16.msra.mxu0 %v1169_v56  ;;  %1096 = vmatprep.subr.bf16.mxu1 %v1213_v1 }
  0xef   :  { %1076 = vmatprep.subr.bf16.mxu0 %v1213_v1 }
  0xf1   :  { %1097 = vmatpush3.bf16.msra.mxu1 %v1172_v57 }
  0xf2   :  { %1077 = vmatpush3.bf16.msra.mxu0 %v1171_v58  ;;  %1098 = vmatprep.subr.bf16.mxu1 %v1213_v1 }
  0xf3   :  { %1078 = vmatprep.subr.bf16.mxu0 %v1213_v1 }
  0xf5   :  { %1099 = vmatpush3.bf16.msra.mxu1 %v1174_v59 }
  0xf6   :  { %1079 = vmatpush3.bf16.msra.mxu0 %v1173_v60  ;;  %1100 = vmatprep.subr.bf16.mxu1 %v1213_v1 }
  0xf7   :  { %1080 = vmatprep.subr.bf16.mxu0 %v1213_v1 }
  0xf9   :  { %1101 = vmatpush3.bf16.msra.mxu1 %v1176_v61 }
  0xfa   :  { %1081 = vmatpush3.bf16.msra.mxu0 %v1175_v62  ;;  %1102 = vmatprep.subr.bf16.mxu1 %v1213_v1 }
  0xfb   :  { %1082 = vmatprep.subr.bf16.mxu0 %v1213_v1 }
  0xfd   :  { %1103 = vmatpush3.bf16.msra.mxu1 %v1178_v63 }
  0xfe   :  { %1083 = vmatpush3.bf16.msra.mxu0 %v1177_v0  ;;  %1104 = vmatprep.subr.bf16.mxu1 %v1213_v1 }
  0xff   :  { %1084 = vmatprep.subr.bf16.mxu0 %v1213_v1 }
 0x101   :  { %1105 = vmatpush3.bf16.msra.mxu1 %v1180_v2 }
 0x102   :  { %1085 = vmatpush3.bf16.msra.mxu0 %v1179_v3  ;;  %1106 = vmatprep.subr.bf16.mxu1 %v1213_v1 }
 0x103   :  { %1086 = vmatprep.subr.bf16.mxu0 %v1213_v1 }
 0x105   :  { %1107 = vmatpush3.bf16.msra.mxu1 %v1182_v5 }
 0x106   :  { %1087 = vmatpush3.bf16.msra.mxu0 %v1181_v4 }
 0x107   :  { %1112 = vmatprep.subr.bf16.mxu0 %v1213_v1 }
 0x1a8   :  { %v515_v8 = vpop.f32.mrf.mxu1 }
 0x1a9   :  { %v393_v9 = vpop.f32.mrf.mxu0  ;;  %v516_v10 = vadd.f32 %v894_v6, %v515_v8 }
 0x1aa   :  { %v394_v11 = vadd.f32 %v884_v7, %v393_v9  ;;  %v1070_v12 = vpop.f32.mrf.mxu1 }
 0x1ab   :  { %v538_v14 = vpack.c.bf16 %v516_v10, %v516_v10  ;;  %v1050_v15 = vpop.f32.mrf.mxu0 }
 0x1ac   :  { %v521_v16 = vpack.c.bf16 %v394_v11, %v394_v11  ;;  %v518_v17 = vpop.f32.mrf.mxu1 }
 0x1ad   :  { %v396_v18 = vpop.f32.mrf.mxu0  ;;  %1089 = vmatmul.mubr.bf16.vlgmr.msra.gmra.mxu0 %v538_v14 }
 0x1ae   :  { %1109 = vmatmul.mubr.bf16.vlgmr.msra.gmra.mxu1 %v521_v16  ;;  %v1071_v19 = vpop.f32.mrf.mxu1  ;;  %1113 = vmatpush3.bf16.msra.mxu0 %v1183_v13 }
 0x1af   :  { %v1051_v21 = vpop.f32.mrf.mxu0  ;;  %1114 = vmatprep.subr.bf16.mxu0 %v1213_v1  ;;  %1128 = vmatprep.mubr.msk.bf16.mxu0 %vm1214_vm0, %v1213_v1 }
 0x1b2   :  { %1115 = vmatpush3.bf16.msra.mxu0 %v1184_v20 }
 0x1b3   :  { %1116 = vmatprep.subr.bf16.mxu0 %v1213_v1 }
 0x1b6   :  { %1117 = vmatpush3.bf16.msra.mxu0 %v1185_v22 }
 0x1b7   :  { %1118 = vmatprep.subr.bf16.mxu0 %v1213_v1 }
 0x1ba   :  { %1119 = vmatpush3.bf16.msra.mxu0 %v1186_v23 }
 0x1bb   :  { %1120 = vmatprep.subr.bf16.mxu0 %v1213_v1 }
 0x1be   :  { %1121 = vmatpush3.bf16.msra.mxu0 %v1187_v24 }
 0x1bf   :  { %1122 = vmatprep.subr.bf16.mxu0 %v1213_v1 }
 0x1c2   :  { %1123 = vmatpush3.bf16.msra.mxu0 %v1188_v25 }
 0x1c3   :  { %1124 = vmatprep.subr.bf16.mxu0 %v1213_v1 }
 0x1c6   :  { %1125 = vmatpush3.bf16.msra.mxu0 %v1189_v26 }
 0x1c7   :  { %1126 = vmatprep.subr.bf16.mxu0 %v1213_v1 }
 0x1ca   :  { %1127 = vmatpush3.bf16.msra.mxu0 %v1190_v27 }
 0x26d   :  { %v637_v28 = vpop.f32.mrf.mxu0 }
 0x26e   :  { %v725_v29 = vpop.f32.mrf.mxu1 }
 0x26f   :  { %v726_v31 = vadd.f32 %v725_v29, %v637_v28  ;;  %v1090_v32 = vpop.f32.mrf.mxu0 }
 0x270   :  { %v1110_v33 = vpop.f32.mrf.mxu1 }
 0x271   :  { %v738_v34 = vadd.f32 %v919_v30, %v726_v31  ;;  %v640_v35 = vpop.f32.mrf.mxu0 }
 0x272   :  { %v728_v36 = vpop.f32.mrf.mxu1 }
 0x273   :  { %v739_v37 = vmax.f32 %v738_v34, 0.0  ;;  %v1091_v38 = vpop.f32.mrf.mxu0 }
 0x274   :  { %v1111_v1 = vpop.f32.mrf.mxu1 }
 0x275   :  { %v740_v39 = vpack.c.bf16 %v739_v37, %v739_v37 }
 0x277   :  { %1129 = vmatmul.mubr.bf16.vlgmr.msra.gmra.mxu0 %v740_v39 }
 0x337   :  { %v846_v41 = vpop.f32.mrf.mxu0 }
 0x338   :  { %v847_v42 = vadd.f32 %v920_v40, %v846_v41 }
 0x339   :  { %v1130_v43 = vpop.f32.mrf.mxu0 }
 0x33a   :  { %852 = vst [vmem:[#allocation3] sm:$0xff] %v847_v42 }
 0x33b   :  { %v849_v44 = vpop.f32.mrf.mxu0 }
 0x33c   :  { %1202 = shalt.err (!%p1199_p4)
}
 0x33d   :  { %862 = dma.vmem_to_hbm [thread:$0]  %s860_s24, 128, %s1576_s15, [#allocation4]   ;;  %v1131_v45 = vpop.f32.mrf.mxu0 }
 0x33e   :  { %1211 = dma.done.wait [#allocation4], 128  }
 0x33f   :  { %1212 = vsyncadd [#allocation4], 4294967168 }
 0x340   :  { %866 = vsyncpa [#allocation4], 1 }

</bundles_post_ra>
